<compile_context>
chip_gen: v6e
topology: v6e:2x2x1
jax: 0.10.0
libtpu: 0.0.40
codegen_flags: <defaults>
</compile_context>

<pallas_src>
import jax
import jax.numpy as jnp
from jax.experimental import pallas as pl
from jax.experimental.pallas import tpu as pltpu

D_IN = 30
D_H = 15
D_OUT = 2
MAX_TILE_B = 4096  # ~12 MiB live (x + 2 outs, double-buffered) -> fits all gens


def _round_up(n: int, m: int) -> int:
    return (n + m - 1) // m * m


def mlp_kernel(x_ref, w1_ref, b1_ref, w2_ref, b2_ref, hidden_ref, logits_ref):
    # fc1 on the MXU with f32 accumulation, ReLU on the VPU.
    x = x_ref[...]
    h = jnp.maximum(
        jnp.dot(x, w1_ref[...], preferred_element_type=jnp.float32) + b1_ref[...],
        0.0,
    )
    hidden_ref[...] = h
    # fc2 uses the real (15, 2) weight — tiny MXU pass, no oversized slab.
    logits_ref[...] = (
        jnp.dot(h, w2_ref[...], preferred_element_type=jnp.float32) + b2_ref[...]
    )


@jax.jit
def net_forward(x, w1, b1, w2, b2):
    """x: (B, 30) f32; w1: (30, 15); b1: (15,); w2: (15, 2); b2: (2,).

    Returns (logits (B, 2), hidden (B, 15)) — same as the PyTorch forward.
    """
    B = x.shape[0]

    b1r = b1.reshape(1, D_H)
    b2r = b2.reshape(1, D_OUT)

    # --- batch tiling: aim for >= 2 grid steps (v7x megacore), ragged last
    # block handled by Pallas (no jnp.pad copy). ----------------------------
    tile_b = min(MAX_TILE_B, _round_up(max(pl.cdiv(B, 2), 1), 8))
    grid = (pl.cdiv(B, tile_b),)

    cost = pl.CostEstimate(
        flops=2 * B * (D_IN * D_H + D_H * D_OUT),
        transcendentals=0,
        bytes_accessed=(
            B * (D_IN + D_H + D_OUT) * 4                      # x read + both outputs
            + (D_IN * D_H + D_H + D_H * D_OUT + D_OUT) * 4    # resident params
        ),
    )

    logits, hidden = pl.pallas_call(
        mlp_kernel,
        out_shape=(
            jax.ShapeDtypeStruct((B, D_H), jnp.float32),    # hidden (ReLU output)
            jax.ShapeDtypeStruct((B, D_OUT), jnp.float32),  # logits (fc2 output)
        ),
        grid=grid,
        in_specs=[
            pl.BlockSpec((tile_b, D_IN), lambda i: (i, 0)),   # x: tiled over batch
            pl.BlockSpec((D_IN, D_H), lambda i: (0, 0)),      # weights stay resident
            pl.BlockSpec((1, D_H), lambda i: (0, 0)),
            pl.BlockSpec((D_H, D_OUT), lambda i: (0, 0)),
            pl.BlockSpec((1, D_OUT), lambda i: (0, 0)),
        ],
        out_specs=(
            pl.BlockSpec((tile_b, D_H), lambda i: (i, 0)),
            pl.BlockSpec((tile_b, D_OUT), lambda i: (i, 0)),
        ),
        compiler_params=pltpu.CompilerParams(
            dimension_semantics=("parallel",),       # shard batch tiles across TCs (v7x)
            vmem_limit_bytes=32 * 1024 * 1024,
        ),
        cost_estimate=cost,
    )(x, w1, b1r, w2, b2r)[::-1]  # kernel emits (hidden, logits); return (logits, hidden)

    return logits, hidden


def init_params(key):
    # Deterministic init mimicking nn.Linear's uniform(-1/sqrt(fan_in), 1/sqrt(fan_in)).
    k1, k2, k3, k4 = jax.random.split(key, 4)
    bound1 = 1.0 / jnp.sqrt(30.0)
    bound2 = 1.0 / jnp.sqrt(15.0)
    # Stored as (in_features, out_features) = PyTorch weight.T
    w1 = jax.random.uniform(k1, (D_IN, D_H), jnp.float32, -bound1, bound1)
    b1 = jax.random.uniform(k2, (D_H,), jnp.float32, -bound1, bound1)
    w2 = jax.random.uniform(k3, (D_H, D_OUT), jnp.float32, -bound2, bound2)
    b2 = jax.random.uniform(k4, (D_OUT,), jnp.float32, -bound2, bound2)
    return w1, b1, w2, b2


if __name__ == "__main__":
    key = jax.random.PRNGKey(0)
    k_x, k_p = jax.random.split(key)
    w1, b1, w2, b2 = init_params(k_p)

    ok = True
    for batch in (8, 13):  # 13 exercises the ragged (partial last block) path
        x = jax.random.normal(jax.random.fold_in(k_x, batch), (batch, D_IN),
                              dtype=jnp.float32)
        logits, hidden = net_forward(x, w1, b1, w2, b2)
        jax.block_until_ready((logits, hidden))

        # Cross-check against a plain JAX reference.
        ref_h = jnp.maximum(x @ w1 + b1, 0.0)
        ref_logits = ref_h @ w2 + b2
        assert logits.shape == (batch, D_OUT) and hidden.shape == (batch, D_H)
        ok &= bool(jnp.allclose(hidden, ref_h, atol=1e-4, rtol=1e-4))
        ok &= bool(jnp.allclose(logits, ref_logits, atol=1e-4, rtol=1e-4))

    assert ok, "mismatch vs. JAX reference"
    print("KERNEL_OK")
</pallas_src>

<mosaic_0001>
module attributes {stable_mosaic.version = 11 : i64} {
  func.func @mlp_kernel(%arg0: i32, %arg1: memref<8x30xf32, #tpu.memory_space<vmem>>, %arg2: memref<30x15xf32, #tpu.memory_space<vmem>>, %arg3: memref<1x15xf32, #tpu.memory_space<vmem>>, %arg4: memref<15x2xf32, #tpu.memory_space<vmem>>, %arg5: memref<1x2xf32, #tpu.memory_space<vmem>>, %arg6: memref<8x15xf32, #tpu.memory_space<vmem>>, %arg7: memref<8x2xf32, #tpu.memory_space<vmem>>) attributes {dimension_semantics = [#tpu.dimension_semantics<parallel>], iteration_bounds = array<i64: 1>, scalar_prefetch = 0 : i64, scratch_operands = 0 : i64, tpu.core_type = #tpu.core_type<tc>, window_params = [{transform_indices = @transform_0, window_bounds = array<i64: 8, 30>}, {pipeline_mode = #tpu.pipeline_mode<synchronous>, transform_indices = @transform_1, window_bounds = array<i64: 30, 15>}, {pipeline_mode = #tpu.pipeline_mode<synchronous>, transform_indices = @transform_2, window_bounds = array<i64: 1, 15>}, {pipeline_mode = #tpu.pipeline_mode<synchronous>, transform_indices = @transform_3, window_bounds = array<i64: 15, 2>}, {pipeline_mode = #tpu.pipeline_mode<synchronous>, transform_indices = @transform_4, window_bounds = array<i64: 1, 2>}, {transform_indices = @transform_5, window_bounds = array<i64: 8, 15>}, {transform_indices = @transform_6, window_bounds = array<i64: 8, 2>}]} {
    %c0 = arith.constant 0 : index
    %c0_0 = arith.constant 0 : index
    %0 = vector.load %arg1[%c0, %c0_0] : memref<8x30xf32, #tpu.memory_space<vmem>>, vector<8x30xf32>
    %c0_1 = arith.constant 0 : index
    %c0_2 = arith.constant 0 : index
    %1 = vector.load %arg2[%c0_1, %c0_2] : memref<30x15xf32, #tpu.memory_space<vmem>>, vector<30x15xf32>
    %cst = arith.constant dense<0.000000e+00> : vector<8x15xf32>
    %2 = tpu.matmul %0, %1, %cst {dimension_numbers = #tpu.dot_dimension_numbers<[1], [0], [0], [1], [0, 0, 1, 1], [], []>} : vector<8x30xf32>, vector<30x15xf32>, vector<8x15xf32> -> vector<8x15xf32>
    %c0_3 = arith.constant 0 : index
    %c0_4 = arith.constant 0 : index
    %3 = vector.load %arg3[%c0_3, %c0_4] : memref<1x15xf32, #tpu.memory_space<vmem>>, vector<1x15xf32>
    %4 = vector.broadcast %3 : vector<1x15xf32> to vector<8x15xf32>
    %5 = arith.addf %2, %4 : vector<8x15xf32>
    %cst_5 = arith.constant 0.000000e+00 : f32
    %6 = vector.broadcast %cst_5 : f32 to vector<8x15xf32>
    %7 = arith.maximumf %5, %6 : vector<8x15xf32>
    %c0_6 = arith.constant 0 : index
    %c0_7 = arith.constant 0 : index
    %8 = vector.load %arg6[%c0_6, %c0_7] : memref<8x15xf32, #tpu.memory_space<vmem>>, vector<8x15xf32>
    tpu.vector_store %arg6[%c0_6, %c0_7], %7 {strides = array<i32>} : memref<8x15xf32, #tpu.memory_space<vmem>>, vector<8x15xf32>,
    %c0_8 = arith.constant 0 : index
    %c0_9 = arith.constant 0 : index
    %9 = vector.load %arg4[%c0_8, %c0_9] : memref<15x2xf32, #tpu.memory_space<vmem>>, vector<15x2xf32>
    %cst_10 = arith.constant dense<0.000000e+00> : vector<8x2xf32>
    %10 = tpu.matmul %7, %9, %cst_10 {dimension_numbers = #tpu.dot_dimension_numbers<[1], [0], [0], [1], [0, 0, 1, 1], [], []>} : vector<8x15xf32>, vector<15x2xf32>, vector<8x2xf32> -> vector<8x2xf32>
    %c0_11 = arith.constant 0 : index
    %c0_12 = arith.constant 0 : index
    %11 = vector.load %arg5[%c0_11, %c0_12] : memref<1x2xf32, #tpu.memory_space<vmem>>, vector<1x2xf32>
    %12 = vector.broadcast %11 : vector<1x2xf32> to vector<8x2xf32>
    %13 = arith.addf %10, %12 : vector<8x2xf32>
    %c0_13 = arith.constant 0 : index
    %c0_14 = arith.constant 0 : index
    %14 = vector.load %arg7[%c0_13, %c0_14] : memref<8x2xf32, #tpu.memory_space<vmem>>, vector<8x2xf32>
    tpu.vector_store %arg7[%c0_13, %c0_14], %13 {strides = array<i32>} : memref<8x2xf32, #tpu.memory_space<vmem>>, vector<8x2xf32>,
    return
  }
  func.func @transform_0(%arg0: i32) -> (i32, i32) {
    %c0_i32 = arith.constant 0 : i32
    %c0_i32_0 = arith.constant 0 : i32
    return %arg0, %c0_i32 : i32, i32
  }
  func.func @transform_1(%arg0: i32) -> (i32, i32) {
    %c0_i32 = arith.constant 0 : i32
    %c0_i32_0 = arith.constant 0 : i32
    %c0_i32_1 = arith.constant 0 : i32
    return %c0_i32, %c0_i32_0 : i32, i32
  }
  func.func @transform_2(%arg0: i32) -> (i32, i32) {
    %c0_i32 = arith.constant 0 : i32
    %c0_i32_0 = arith.constant 0 : i32
    %c0_i32_1 = arith.constant 0 : i32
    return %c0_i32, %c0_i32_0 : i32, i32
  }
  func.func @transform_3(%arg0: i32) -> (i32, i32) {
    %c0_i32 = arith.constant 0 : i32
    %c0_i32_0 = arith.constant 0 : i32
    %c0_i32_1 = arith.constant 0 : i32
    return %c0_i32, %c0_i32_0 : i32, i32
  }
  func.func @transform_4(%arg0: i32) -> (i32, i32) {
    %c0_i32 = arith.constant 0 : i32
    %c0_i32_0 = arith.constant 0 : i32
    %c0_i32_1 = arith.constant 0 : i32
    return %c0_i32, %c0_i32_0 : i32, i32
  }
  func.func @transform_5(%arg0: i32) -> (i32, i32) {
    %c0_i32 = arith.constant 0 : i32
    %c0_i32_0 = arith.constant 0 : i32
    return %arg0, %c0_i32 : i32, i32
  }
  func.func @transform_6(%arg0: i32) -> (i32, i32) {
    %c0_i32 = arith.constant 0 : i32
    %c0_i32_0 = arith.constant 0 : i32
    return %arg0, %c0_i32 : i32, i32
  }
}

</mosaic_0001>

<bundles_post_ra>
// kernel: net_forward.1
= control target key start
LH: loop header
LB: loop body
LE: loop exit
PB: predicated region body
PF: predicated region fallthrough
CT: control target
= control target key end

     0   :  { %vm39_vm0 = vcmask 1045504   ;;  %v279_v1 = vmov 0.0   ;;  %vm280_vm1 = vmmov 0   ;;  %s350_s0 = inlined_call_operand.vmem [shape: f32[8,30], index: 0, kind: input, shape index: {}]   ;;  %s351_s1 = inlined_call_operand.vmem [shape: f32[30,15], index: 1, kind: input, shape index: {}]   ;;  %s352_s2 = inlined_call_operand.vmem [shape: f32[1,15], index: 2, kind: input, shape index: {}]   ;;  %s353_s3 = inlined_call_operand.vmem [shape: f32[15,2], index: 3, kind: input, shape index: {}]   ;;  %s354_s4 = inlined_call_operand.vmem [shape: f32[1,2], index: 4, kind: input, shape index: {}]   ;;  %s355_s5 = inlined_call_operand.hbm [shape: f32[8,15], index: 5, kind: output, shape index: {0}]   ;;  %s356_s6 = inlined_call_operand.vmem [shape: f32[8,2], index: 6, kind: output, shape index: {1}]  }
   0x1   :  { %v27_v0 = vld [vmem:[%s351_s1 + $0x18] sm:$0x3f]  ;;  %236 = vmatprep.subr.mxu0 %v279_v1  ;;  %v26_v2 = vld [vmem:[%s351_s1 + $0x10] sm:$0xff]  ;;  %247 = vmatprep.subr.mxu1 %v279_v1 }
   0x2   :  { %237 = vmatpush3.msk.msra.mxu0 %vm39_vm0, %v27_v0  ;;  %244 = vmatprep.mubr.msk.f32.mxu0 %vm280_vm1, %v279_v1 }
   0x3   :  { %12 = vsyncpa [#allocation3], 0  ;;  %238 = vmatprep.subr.mxu0 %v279_v1  ;;  %v25_v3 = vld [vmem:[%s351_s1 + $0x8] sm:$0xff]  ;;  %251 = vmatprep.mubr.msk.f32.mxu1 %vm280_vm1, %v279_v1  ;;  %v24_v4 = vld [vmem:[%s351_s1] sm:$0xff]  ;;  %vm35_vm2 = vcmask 244736   ;;  %vm128_vm3 = vcmask 1046528  }
   0x4   :  { %239 = vmatpush3.msra.mxu0 %v26_v2  ;;  %v23_v5 = vld [vmem:[%s350_s0] sm:$0xff]  ;;  %v117_v6 = vld [vmem:[%s353_s3 + $0x8] sm:$0x7f]  ;;  %vm114_vm4 = vcmask 121856   ;;  %s281_s0 = smov [#allocation2]  }
   0x5   :  { %240 = vmatprep.subr.mxu0 %v279_v1  ;;  %248 = vmatpush3.msk.msra.mxu1 %vm128_vm3, %v117_v6  ;;  %v116_v7 = vld [vmem:[%s353_s3] sm:$0xff]  ;;  %s210_s12 = sshll.u32 %s281_s0, 4  ;;  %s211_s12 = int_to_ptr.vmem [resolvable:$true] %s210_s12 }
   0x6   :  { %241 = vmatpush3.msra.mxu0 %v25_v3  ;;  %249 = vmatprep.subr.mxu1 %v279_v1  ;;  %v222_v8 = vld [vmem:[%s352_s2] ss:$0 sm:$0xff]  ;;  %s257_s13 = scalar_lea.vmem %s211_s12, 128  ;;  %p262_p1 = scmp.lt.s32.totalorder %s211_s12, %s211_s12 }
   0x7   :  { %242 = vmatprep.subr.mxu0 %v279_v1  ;;  %250 = vmatpush3.msra.mxu1 %v116_v7  ;;  %p258_p0 = scmp.ne.s32.totalorder %s211_s12, %s257_s13  ;;  %p263_p2 = scmp.lt.s32.totalorder %s257_s13, %s257_s13 }
   0x8   :  { %243 = vmatpush3.msra.mxu0 %v24_v4 }
   0x9   :  { %245 = vmatmul.mubr.msk.f32.vlgmr.msra.gmra.mxu0 %vm35_vm2, %v23_v5  ;;  %p264_p3 = por %p263_p2, %p262_p1 }
   0xb   :  { %p265_p4 = pnand %p264_p3, %p258_p0 }
  0xc9   :  { %v109_v9 = vpop.f32.mrf.mxu0 }
  0xca   :  { %v110_v10 = vadd.f32 %v222_v8, %v109_v9 }
  0xcb   :  { %v246_v11 = vpop.f32.mrf.mxu0 }
  0xcc   :  { %v113_v12 = vmax.f32 %v110_v10, 0.0 }
  0xce   :  { %252 = vmatmul.mubr.msk.f32.vlgmr.msra.gmra.mxu1 %vm114_vm4, %v113_v12  ;;  %115 = vst.msk [vmem:[#allocation2] sm:$0xff] %vm114_vm4, %v113_v12 }
  0xcf   :  { %268 = shalt.err (!%p265_p4)
}
  0xd0   :  { %213 = dma.vmem_to_hbm [thread:$0]  %s211_s12, 128, %s355_s5, [#allocation3]   ;;  %v225_v13 = vld [vmem:[%s354_s4] ss:$0 sm:$0xff]  ;;  %vm202_vm5 = vcmask 15360  }
 0x18e   :  { %v198_v14 = vpop.f32.mrf.mxu1 }
 0x18f   :  { %v199_v15 = vadd.f32 %v225_v13, %v198_v14 }
 0x190   :  { %v253_v16 = vpop.f32.mrf.mxu1 }
 0x191   :  { %203 = vst.msk [vmem:[%s356_s6] sm:$0xff] %vm202_vm5, %v199_v15 }
 0x192   :  { %277 = dma.done.wait [#allocation3], 128  }
 0x193   :  { %278 = vsyncadd [#allocation3], 4294967168 }
 0x194   :  { %221 = vsyncpa [#allocation3], 1 }

</bundles_post_ra>
